<compile_context>
chip_gen: v6e
topology: v6e:2x2x1
jax: 0.10.0
libtpu: 0.0.40
codegen_flags: <defaults>
</compile_context>

<pallas_src>
import functools

import jax
import jax.numpy as jnp
from jax import lax
from jax.experimental import pallas as pl
from jax.experimental.pallas import tpu as pltpu

IN_DIM = 128  # in_dim of the head (fixed by the module)


def _round_up(x, m):
    return (x + m - 1) // m * m


# ---------------------------------------------------------------------------
# kernel (channel-major: channels on sublanes, points on lanes)
# ---------------------------------------------------------------------------
def ancsh_head_kernel(x_ref, w_ref, b_ref, out_ref, *,
                      n_parts, soft_rows, sig_rows, tanh_rows):
    P = n_parts
    x = x_ref[0]                                              # (128, tile_n) bf16

    # single fused matmul over all heads (trunk folded offline), f32 accumulate
    z = jnp.dot(w_ref[...], x,
                preferred_element_type=jnp.float32) + b_ref[...]

    # ---- softmax slab: rows [0, soft_rows) = [W(P) | joint_cls(P) | pad]
    zs = z[0:soft_rows, :]
    row = lax.broadcasted_iota(jnp.int32, zs.shape, 0)
    m_w = row < P
    m_c = jnp.logical_and(row >= P, row < 2 * P)
    neg = jnp.float32(-1e30)
    max_w = jnp.max(jnp.where(m_w, zs, neg), axis=0, keepdims=True)
    max_c = jnp.max(jnp.where(m_c, zs, neg), axis=0, keepdims=True)
    e = jnp.exp(zs - jnp.where(m_w, max_w, max_c))            # one exp pass
    sum_w = jnp.sum(jnp.where(m_w, e, 0.0), axis=0, keepdims=True)
    sum_c = jnp.sum(jnp.where(m_c, e, 0.0), axis=0, keepdims=True)
    # exact division so W / index_per_point rows sum to 1 for the MIoU loss
    soft = e / jnp.where(m_w, sum_w, sum_c)
    out_ref[0, 0:soft_rows, :] = soft.astype(out_ref.dtype)

    # ---- sigmoid slab: [nocs(3P) | confi(1) | heatmap(1) | pad]
    zg = z[soft_rows:soft_rows + sig_rows, :]
    sig = 0.5 * (jnp.tanh(0.5 * zg) + 1.0)                    # stable sigmoid, 1 EUP op
    out_ref[0, soft_rows:soft_rows + sig_rows, :] = sig.astype(out_ref.dtype)

    # ---- tanh slab: [unitvec(3) | joint_axis(3) | pad]
    zt = z[soft_rows + sig_rows:soft_rows + sig_rows + tanh_rows, :]
    out_ref[0, soft_rows + sig_rows:, :] = jnp.tanh(zt).astype(out_ref.dtype)


# ---------------------------------------------------------------------------
# parameter packing / offline affine fold (plain JAX glue, one-time, tiny)
# ---------------------------------------------------------------------------
def fuse_params(p):
    """Fold the affine trunk (conv_joint_feat, BN/Dropout in eval mode) into the
    4 joint heads, and pack everything into ONE channel-major (C_out, 128)
    weight matrix (bf16) + bias column (f32), grouped by activation with each
    group zero-padded to an 8-row boundary."""
    P = p['wW'].shape[1]

    # trunk (BN already folded into wJ1/wJ2 by the parameter glue)
    A1, b1 = p['wJ1'].T, p['bJ1'].T            # (128,128), (128,1)  out,in
    A2, b2 = p['wJ2'].T, p['bJ2'].T
    A21 = A2 @ A1                              # (128,128)
    b21 = A2 @ b1 + b2                         # (128,1)

    def fold(w, b):                            # w: (128,c) in,out ; b: (1,c)
        return w.T @ A21, w.T @ b21 + b.T      # -> (c,128), (c,1)

    wH, bH = fold(p['wH'], p['bH'])
    wU, bU = fold(p['wU'], p['bU'])
    wA, bA = fold(p['wA'], p['bA'])
    wJc, bJc = fold(p['wJc'], p['bJc'])

    soft_rows = _round_up(2 * P, 8)            # [W | joint_cls]
    sig_rows = _round_up(3 * P + 2, 8)         # [nocs | confi | heatmap]
    tanh_rows = _round_up(6, 8)                # [unitvec | joint_axis]

    def pad_rows(w, b, rows):
        extra = rows - w.shape[0]
        if extra:
            w = jnp.concatenate([w, jnp.zeros((extra, IN_DIM), w.dtype)], 0)
            b = jnp.concatenate([b, jnp.zeros((extra, 1), b.dtype)], 0)
        return w, b

    w_soft, b_soft = pad_rows(jnp.concatenate([p['wW'].T, wJc], 0),
                              jnp.concatenate([p['bW'].T, bJc], 0), soft_rows)
    w_sig, b_sig = pad_rows(jnp.concatenate([p['wN'].T, p['wC'].T, wH], 0),
                            jnp.concatenate([p['bN'].T, p['bC'].T, bH], 0), sig_rows)
    w_tanh, b_tanh = pad_rows(jnp.concatenate([wU, wA], 0),
                              jnp.concatenate([bU, bA], 0), tanh_rows)

    w = jnp.concatenate([w_soft, w_sig, w_tanh], 0).astype(jnp.bfloat16)
    b = jnp.concatenate([b_soft, b_sig, b_tanh], 0).astype(jnp.float32)
    return dict(w=w, b=b, n_parts=P,
                soft_rows=soft_rows, sig_rows=sig_rows, tanh_rows=tanh_rows)


# ---------------------------------------------------------------------------
# wrapper
# ---------------------------------------------------------------------------
def ancsh_head_forward(x_ncw, params, *, tile_n=1024, layout='nwc'):
    """x_ncw: (B, 128, N), the PyTorch Conv1d (NCW) input.
    layout='nwc' returns module-equivalent (B, N, C) f32 tensors;
    layout='ncw' returns the kernel's channel-major bf16 slices (no transpose pass)."""
    B, C, N = x_ncw.shape
    assert C == IN_DIM
    assert tile_n % 128 == 0

    fused = fuse_params(params)
    P = fused['n_parts']
    soft_rows, sig_rows, tanh_rows = (fused['soft_rows'], fused['sig_rows'],
                                      fused['tanh_rows'])
    out_c = soft_rows + sig_rows + tanh_rows

    tile = min(tile_n, _round_up(N, 128))
    grid = (B, pl.cdiv(N, tile))                  # partial edge block, no jnp.pad
    x = x_ncw.astype(jnp.bfloat16)                # halve the dominant HBM read

    def xmap(b, n):
        return (b, 0, n)

    def wmap(b, n):
        return (0, 0)

    flops = 2 * B * N * IN_DIM * out_c
    transcendentals = B * N * out_c
    bytes_accessed = (x.size * 2 + B * out_c * N * 2
                      + fused['w'].size * 2 + fused['b'].size * 4)

    out = pl.pallas_call(
        functools.partial(ancsh_head_kernel, n_parts=P, soft_rows=soft_rows,
                          sig_rows=sig_rows, tanh_rows=tanh_rows),
        out_shape=jax.ShapeDtypeStruct((B, out_c, N), jnp.bfloat16),
        grid_spec=pltpu.PrefetchScalarGridSpec(
            num_scalar_prefetch=0,
            grid=grid,
            in_specs=[pl.BlockSpec((1, IN_DIM, tile), xmap),
                      pl.BlockSpec(fused['w'].shape, wmap),
                      pl.BlockSpec(fused['b'].shape, wmap)],
            out_specs=pl.BlockSpec((1, out_c, tile), xmap)),
        compiler_params=pltpu.CompilerParams(
            dimension_semantics=("parallel", "parallel")),
        cost_estimate=pl.CostEstimate(flops=flops,
                                      transcendentals=transcendentals,
                                      bytes_accessed=bytes_accessed),
    )(x, fused['w'], fused['b'])

    def take(lo, hi):
        sl = out[:, lo:hi, :]
        if layout == 'ncw':
            return sl                              # channel-major, zero extra pass
        return jnp.transpose(sl, (0, 2, 1)).astype(jnp.float32)

    s, g = soft_rows, soft_rows + sig_rows
    return {
        'W':                    take(0, P),
        'nocs_per_point':       take(s, s + 3 * P),
        'confi_per_point':      take(s + 3 * P, s + 3 * P + 1),
        'heatmap_per_point':    take(s + 3 * P + 1, s + 3 * P + 2),
        'unitvec_per_point':    take(g, g + 3),
        'joint_axis_per_point': take(g + 3, g + 6),
        'index_per_point':      take(P, 2 * P),
    }


# ---------------------------------------------------------------------------
# synthetic params + plain-JAX reference (mirrors the PyTorch forward)
# ---------------------------------------------------------------------------
def init_params(key, n_max_parts):
    """1x1 Conv1d weights stored as (C_in, C_out); eval-mode BatchNorm with
    default running stats folded into conv_joint_feat."""
    P = n_max_parts
    ks = jax.random.split(key, 16)

    def conv(k, c_in, c_out, scale=0.05):
        kw, kb = jax.random.split(k)
        w = jax.random.normal(kw, (c_in, c_out), jnp.float32) * scale
        b = jax.random.normal(kb, (1, c_out), jnp.float32) * scale
        return w, b

    p = {}
    p['wW'], p['bW'] = conv(ks[0], IN_DIM, P)            # conv_W
    p['wN'], p['bN'] = conv(ks[1], IN_DIM, 3 * P)        # conv_nocs
    p['wC'], p['bC'] = conv(ks[2], IN_DIM, 1)            # conv_confi

    wJ1, bJ1 = conv(ks[3], IN_DIM, 128)
    wJ2, bJ2 = conv(ks[4], IN_DIM, 128)
    eps = 1e-5
    gamma = jnp.ones((128,)); beta = jnp.zeros((128,))
    rm = jnp.zeros((128,)); rv = jnp.ones((128,))
    s = gamma / jnp.sqrt(rv + eps)
    p['wJ1'] = wJ1 * s[None, :]
    p['bJ1'] = (bJ1 - rm[None, :]) * s[None, :] + beta[None, :]
    p['wJ2'] = wJ2 * s[None, :]
    p['bJ2'] = (bJ2 - rm[None, :]) * s[None, :] + beta[None, :]

    p['wH'], p['bH'] = conv(ks[5], 128, 1)               # conv_heatmap
    p['wU'], p['bU'] = conv(ks[6], 128, 3)               # conv_univect
    p['wA'], p['bA'] = conv(ks[7], 128, 3)               # conv_joint_axis
    p['wJc'], p['bJc'] = conv(ks[8], 128, P)             # conv_joint_cls
    return p


def ancsh_head_reference(x_ncw, params):
    x = jnp.transpose(x_ncw, (0, 2, 1)).astype(jnp.float32)  # (B, N, 128)

    def head(f, w, b):
        return jnp.einsum('bnc,cd->bnd', f, w) + b

    W = jax.nn.softmax(head(x, params['wW'], params['bW']), axis=2)
    nocs = jax.nn.sigmoid(head(x, params['wN'], params['bN']))
    confi = jax.nn.sigmoid(head(x, params['wC'], params['bC']))
    f1 = head(x, params['wJ1'], params['bJ1'])
    f2 = head(f1, params['wJ2'], params['bJ2'])
    heat = jax.nn.sigmoid(head(f2, params['wH'], params['bH']))
    unit = jnp.tanh(head(f2, params['wU'], params['bU']))
    axis = jnp.tanh(head(f2, params['wA'], params['bA']))
    cls = jax.nn.softmax(head(f2, params['wJc'], params['bJc']), axis=2)
    return {
        'W': W, 'nocs_per_point': nocs, 'confi_per_point': confi,
        'heatmap_per_point': heat, 'unitvec_per_point': unit,
        'joint_axis_per_point': axis, 'index_per_point': cls,
    }


if __name__ == "__main__":
    key = jax.random.PRNGKey(0)
    kx, kp = jax.random.split(key)

    B, N, P = 2, 1000, 4            # batch, n_points (exercises partial edge block), parts
    x = jax.random.normal(kx, (B, IN_DIM, N), jnp.float32)   # PyTorch NCW input
    params = init_params(kp, P)

    pred = ancsh_head_forward(x, params, tile_n=1024)
    pred = jax.tree_util.tree_map(jax.block_until_ready, pred)

    ref = ancsh_head_reference(x, params)
    # bf16 input/weights/output + offline affine fold -> compare at 2e-2.
    for k in pred:
        assert pred[k].shape == ref[k].shape, (k, pred[k].shape, ref[k].shape)
        assert jnp.allclose(pred[k], ref[k], atol=2e-2, rtol=2e-2), (
            k, float(jnp.max(jnp.abs(pred[k] - ref[k]))))

    print("KERNEL_OK")
</pallas_src>

<mosaic_0001>
module attributes {stable_mosaic.version = 11 : i64} {
  func.func @ancsh_head_kernel(%arg0: i32, %arg1: i32, %arg2: memref<1x128x1024xbf16, #tpu.memory_space<vmem>>, %arg3: memref<32x128xbf16, #tpu.memory_space<vmem>>, %arg4: memref<32x1xf32, #tpu.memory_space<vmem>>, %arg5: memref<1x32x1024xbf16, #tpu.memory_space<vmem>>) attributes {dimension_semantics = [#tpu.dimension_semantics<parallel>, #tpu.dimension_semantics<parallel>], iteration_bounds = array<i64: 2, 1>, scalar_prefetch = 0 : i64, scratch_operands = 0 : i64, tpu.core_type = #tpu.core_type<tc>, window_params = [{transform_indices = @transform_0, window_bounds = array<i64: 1, 128, 1024>}, {pipeline_mode = #tpu.pipeline_mode<synchronous>, transform_indices = @transform_1, window_bounds = array<i64: 32, 128>}, {pipeline_mode = #tpu.pipeline_mode<synchronous>, transform_indices = @transform_2, window_bounds = array<i64: 32, 1>}, {transform_indices = @transform_3, window_bounds = array<i64: 1, 32, 1024>}]} {
    %c0 = arith.constant 0 : index
    %c0_0 = arith.constant 0 : index
    %c0_1 = arith.constant 0 : index
    %0 = vector.load %arg2[%c0, %c0_0, %c0_1] : memref<1x128x1024xbf16, #tpu.memory_space<vmem>>, vector<1x128x1024xbf16>
    %1 = vector.shape_cast %0 : vector<1x128x1024xbf16> to vector<128x1024xbf16>
    %c0_2 = arith.constant 0 : index
    %c0_3 = arith.constant 0 : index
    %2 = vector.load %arg3[%c0_2, %c0_3] : memref<32x128xbf16, #tpu.memory_space<vmem>>, vector<32x128xbf16>
    %cst = arith.constant dense<0.000000e+00> : vector<32x1024xf32>
    %3 = tpu.matmul %2, %1, %cst {dimension_numbers = #tpu.dot_dimension_numbers<[1], [0], [0], [1], [0, 0, 1, 1], [], []>} : vector<32x128xbf16>, vector<128x1024xbf16>, vector<32x1024xf32> -> vector<32x1024xf32>
    %c0_4 = arith.constant 0 : index
    %c0_5 = arith.constant 0 : index
    %4 = vector.load %arg4[%c0_4, %c0_5] : memref<32x1xf32, #tpu.memory_space<vmem>>, vector<32x1xf32>
    %5 = vector.broadcast %4 : vector<32x1xf32> to vector<32x1024xf32>
    %6 = arith.addf %3, %5 : vector<32x1024xf32>
    %7 = vector.extract_strided_slice %6 {offsets = [0, 0], sizes = [8, 1024], strides = [1, 1]} : vector<32x1024xf32> to vector<8x1024xf32>
    %8 = tpu.iota {dimensions = array<i32: 0>} : vector<8x1024xi32>
    %c4_i32 = arith.constant 4 : i32
    %9 = vector.broadcast %c4_i32 : i32 to vector<8x1024xi32>
    %10 = arith.cmpi slt, %8, %9 : vector<8x1024xi32>
    %c4_i32_6 = arith.constant 4 : i32
    %11 = vector.broadcast %c4_i32_6 : i32 to vector<8x1024xi32>
    %12 = arith.cmpi sge, %8, %11 : vector<8x1024xi32>
    %c8_i32 = arith.constant 8 : i32
    %13 = vector.broadcast %c8_i32 : i32 to vector<8x1024xi32>
    %14 = arith.cmpi slt, %8, %13 : vector<8x1024xi32>
    %15 = arith.andi %12, %14 : vector<8x1024xi1>
    %cst_7 = arith.constant -1.000000e+30 : f32
    %16 = vector.broadcast %cst_7 : f32 to vector<8x1024xf32>
    %17 = arith.select %10, %7, %16 : vector<8x1024xi1>, vector<8x1024xf32>
    %cst_8 = arith.constant dense<0xFF800000> : vector<1024xf32>
    %18 = vector.multi_reduction <maximumf>, %17, %cst_8 [0] : vector<8x1024xf32> to vector<1024xf32>
    %19 = vector.shape_cast %18 : vector<1024xf32> to vector<1x1024xf32>
    %cst_9 = arith.constant -1.000000e+30 : f32
    %20 = vector.broadcast %cst_9 : f32 to vector<8x1024xf32>
    %21 = arith.select %15, %7, %20 : vector<8x1024xi1>, vector<8x1024xf32>
    %cst_10 = arith.constant dense<0xFF800000> : vector<1024xf32>
    %22 = vector.multi_reduction <maximumf>, %21, %cst_10 [0] : vector<8x1024xf32> to vector<1024xf32>
    %23 = vector.shape_cast %22 : vector<1024xf32> to vector<1x1024xf32>
    %24 = vector.shape_cast %19 : vector<1x1024xf32> to vector<1x1024xf32>
    %25 = vector.broadcast %24 : vector<1x1024xf32> to vector<8x1024xf32>
    %26 = vector.shape_cast %23 : vector<1x1024xf32> to vector<1x1024xf32>
    %27 = vector.broadcast %26 : vector<1x1024xf32> to vector<8x1024xf32>
    %28 = arith.select %10, %25, %27 : vector<8x1024xi1>, vector<8x1024xf32>
    %29 = arith.subf %7, %28 : vector<8x1024xf32>
    %30 = math.exp %29 : vector<8x1024xf32>
    %cst_11 = arith.constant 0.000000e+00 : f32
    %31 = vector.broadcast %cst_11 : f32 to vector<8x1024xf32>
    %32 = arith.select %10, %30, %31 : vector<8x1024xi1>, vector<8x1024xf32>
    %cst_12 = arith.constant dense<0.000000e+00> : vector<1024xf32>
    %33 = vector.multi_reduction <add>, %32, %cst_12 [0] : vector<8x1024xf32> to vector<1024xf32>
    %34 = vector.shape_cast %33 : vector<1024xf32> to vector<1x1024xf32>
    %cst_13 = arith.constant 0.000000e+00 : f32
    %35 = vector.broadcast %cst_13 : f32 to vector<8x1024xf32>
    %36 = arith.select %15, %30, %35 : vector<8x1024xi1>, vector<8x1024xf32>
    %cst_14 = arith.constant dense<0.000000e+00> : vector<1024xf32>
    %37 = vector.multi_reduction <add>, %36, %cst_14 [0] : vector<8x1024xf32> to vector<1024xf32>
    %38 = vector.shape_cast %37 : vector<1024xf32> to vector<1x1024xf32>
    %39 = vector.shape_cast %34 : vector<1x1024xf32> to vector<1x1024xf32>
    %40 = vector.broadcast %39 : vector<1x1024xf32> to vector<8x1024xf32>
    %41 = vector.shape_cast %38 : vector<1x1024xf32> to vector<1x1024xf32>
    %42 = vector.broadcast %41 : vector<1x1024xf32> to vector<8x1024xf32>
    %43 = arith.select %10, %40, %42 : vector<8x1024xi1>, vector<8x1024xf32>
    %44 = arith.divf %30, %43 : vector<8x1024xf32>
    %45 = arith.truncf %44 : vector<8x1024xf32> to vector<8x1024xbf16>
    %c0_15 = arith.constant 0 : index
    %c0_16 = arith.constant 0 : index
    %c0_17 = arith.constant 0 : index
    %46 = vector.load %arg5[%c0_15, %c0_16, %c0_17] : memref<1x32x1024xbf16, #tpu.memory_space<vmem>>, vector<1x8x1024xbf16>
    %47 = vector.shape_cast %46 : vector<1x8x1024xbf16> to vector<8x1024xbf16>
    %48 = vector.shape_cast %45 : vector<8x1024xbf16> to vector<1x8x1024xbf16>
    tpu.vector_store %arg5[%c0_15, %c0_16, %c0_17], %48 {strides = array<i32>} : memref<1x32x1024xbf16, #tpu.memory_space<vmem>>, vector<1x8x1024xbf16>,
    %49 = vector.extract_strided_slice %6 {offsets = [8, 0], sizes = [16, 1024], strides = [1, 1]} : vector<32x1024xf32> to vector<16x1024xf32>
    %cst_18 = arith.constant 5.000000e-01 : f32
    %50 = vector.broadcast %cst_18 : f32 to vector<16x1024xf32>
    %51 = arith.mulf %50, %49 : vector<16x1024xf32>
    %52 = math.tanh %51 : vector<16x1024xf32>
    %cst_19 = arith.constant 1.000000e+00 : f32
    %53 = vector.broadcast %cst_19 : f32 to vector<16x1024xf32>
    %54 = arith.addf %52, %53 : vector<16x1024xf32>
    %cst_20 = arith.constant 5.000000e-01 : f32
    %55 = vector.broadcast %cst_20 : f32 to vector<16x1024xf32>
    %56 = arith.mulf %55, %54 : vector<16x1024xf32>
    %57 = arith.truncf %56 : vector<16x1024xf32> to vector<16x1024xbf16>
    %c0_21 = arith.constant 0 : index
    %c8 = arith.constant 8 : index
    %c0_22 = arith.constant 0 : index
    %58 = vector.load %arg5[%c0_21, %c8, %c0_22] : memref<1x32x1024xbf16, #tpu.memory_space<vmem>>, vector<1x16x1024xbf16>
    %59 = vector.shape_cast %58 : vector<1x16x1024xbf16> to vector<16x1024xbf16>
    %60 = vector.shape_cast %57 : vector<16x1024xbf16> to vector<1x16x1024xbf16>
    tpu.vector_store %arg5[%c0_21, %c8, %c0_22], %60 {strides = array<i32>} : memref<1x32x1024xbf16, #tpu.memory_space<vmem>>, vector<1x16x1024xbf16>,
    %61 = vector.extract_strided_slice %6 {offsets = [24, 0], sizes = [8, 1024], strides = [1, 1]} : vector<32x1024xf32> to vector<8x1024xf32>
    %62 = math.tanh %61 : vector<8x1024xf32>
    %63 = arith.truncf %62 : vector<8x1024xf32> to vector<8x1024xbf16>
    %c0_23 = arith.constant 0 : index
    %c24 = arith.constant 24 : index
    %c0_24 = arith.constant 0 : index
    %64 = vector.load %arg5[%c0_23, %c24, %c0_24] : memref<1x32x1024xbf16, #tpu.memory_space<vmem>>, vector<1x8x1024xbf16>
    %65 = vector.shape_cast %64 : vector<1x8x1024xbf16> to vector<8x1024xbf16>
    %66 = vector.shape_cast %63 : vector<8x1024xbf16> to vector<1x8x1024xbf16>
    tpu.vector_store %arg5[%c0_23, %c24, %c0_24], %66 {strides = array<i32>} : memref<1x32x1024xbf16, #tpu.memory_space<vmem>>, vector<1x8x1024xbf16>,
    return
  }
  func.func @transform_0(%arg0: i32, %arg1: i32) -> (i32, i32, i32) {
    %c0_i32 = arith.constant 0 : i32
    %c0_i32_0 = arith.constant 0 : i32
    return %arg0, %c0_i32, %arg1 : i32, i32, i32
  }
  func.func @transform_1(%arg0: i32, %arg1: i32) -> (i32, i32) {
    %c0_i32 = arith.constant 0 : i32
    %c0_i32_0 = arith.constant 0 : i32
    %c0_i32_1 = arith.constant 0 : i32
    return %c0_i32, %c0_i32_0 : i32, i32
  }
  func.func @transform_2(%arg0: i32, %arg1: i32) -> (i32, i32) {
    %c0_i32 = arith.constant 0 : i32
    %c0_i32_0 = arith.constant 0 : i32
    %c0_i32_1 = arith.constant 0 : i32
    return %c0_i32, %c0_i32_0 : i32, i32
  }
  func.func @transform_3(%arg0: i32, %arg1: i32) -> (i32, i32, i32) {
    %c0_i32 = arith.constant 0 : i32
    %c0_i32_0 = arith.constant 0 : i32
    return %arg0, %c0_i32, %arg1 : i32, i32, i32
  }
}

</mosaic_0001>

<bundles_post_ra>
// kernel: tpu_custom_call.1
= control target key start
LH: loop header
LB: loop body
LE: loop exit
PB: predicated region body
PF: predicated region fallthrough
CT: control target
= control target key end

     0   :  { %8 = vsyncpa [#allocation3], 0  ;;  %s2248_s0 = inlined_call_operand.vmem [shape: bf16[2,128,1000], index: 0, kind: input, shape index: {}]   ;;  %s2249_s1 = inlined_call_operand.vmem [shape: bf16[32,128], index: 1, kind: input, shape index: {}]   ;;  %s2250_s2 = inlined_call_operand.vmem [shape: f32[32,1], index: 2, kind: input, shape index: {}]   ;;  %s2251_s3 = inlined_call_operand.hbm [shape: bf16[2,32,1000], index: 3, kind: output, shape index: {}]  }
   0x1   :  { %10 = vsyncpa [#allocation3 + $0x1], 0  ;;  %s1775_s12 = smov 0   ;;  %s1777_s13 = smov 0  }
   0x2   :  { %s1779_s14 = smov 0   ;;  %s1781_s15 = smov 0  }
   0x3   :  { %s1783_s16 = smov 0   ;;  %s1785_s17 = smov 0  }
   0x4 LB: > { %s1418_s18 = sadd.s32 4294967295, %s1749_s17   ;;  %s1419_s19 = sadd.s32 4294967294, %s1749_s17   ;;  %s1749_s17 = sphi %s1785_s17, %s16_s17   ;;  %s1745_s16 = sphi %s1783_s16, %s2258_s16   ;;  %s1741_s15 = sphi %s1781_s15, %s2257_s15   ;;  %s1737_s14 = sphi %s1779_s14, %s2256_s14   ;;  %s1733_s13 = sphi %s1777_s13, %s2255_s13   ;;  %s1729_s12 = sphi %s1775_s12, %s2254_s12  }
   0x5   : > { %s28_s20 = sadd.s32 1, %s1745_s16  ;;  %s107_s21 = sadd.s32 1, %s1737_s14 }
   0x6   : > { %p30_p0 = scmp.ge.s32.totalorder %s28_s20, 2  ;;  %p117_p1 = scmp.ne.s32.totalorder %s1737_s14, %s1733_s13 }
   0x7   : > { %p118_p2 = scmp.eq.s32.totalorder %s1418_s18, 1  ;;  %p123_p3 = scmp.ne.s32.totalorder %s1733_s13, %s1729_s12 }
   0x8   : > { %s2260_s20 = smov (%p30_p0, %s28_s20), 0  ;;  %p124_p5 = scmp.eq.s32.totalorder %s1419_s19, 1 }
   0x9   : > { %p1815_p4 = por %p118_p2, %p117_p1  ;;  %s102_s23 = ssub.s32 %s1745_s16, %s2260_s20 }
   0xa   : > { %p1422_p6 = scmp.ge.s32.totalorder %s1749_s17, 1  ;;  %p105_p7 = scmp.eq.s32.totalorder %s102_s23, 0 }
   0xb   : > { %p1822_p8 = por %p124_p5, %p123_p3  ;;  %p161_p9 = scmp.lt.s32.totalorder %s1749_s17, 3 }
   0xc   : > { %s1828_s25 = scalar_select %p105_p7, %s1737_s14, %s107_s21  }
   0xd   : > { %p162_p10 = pnand %p1422_p6, %p161_p9 }
   0xe   : > { %p190_p11 = scmp.lt.s32.totalorder (!%p162_p10), %s1741_s15, 1  ;;  %s1530_s29 = sshll.u32 (!%p162_p10), %s1741_s15, 11 }
   0xf   : > { %165 = sbr.rel (%p162_p10) target bundleno = 398 (0x18e), region = 32  ;;  %s2196_s6 = scalar_lea.hbm (!%p162_p10), %s2251_s3, %s1530_s29 }
  0x10   : > { %s1752_s8 = smov (!%p162_p10), [#allocation2]  }
  0x14   : > { %v1751_v0 = vmov 0   ;;  %s191_s26 = scalar_select %p190_p11, %s1741_s15, 1  ;;  %v269_v1 = vld [vmem:[%s2250_s2] sm:$0xff]  ;;  %v271_v2 = vld [vmem:[%s2250_s2 + $0x10] sm:$0xff]  ;;  %v270_v3 = vld [vmem:[%s2250_s2 + $0x8] sm:$0xff] }
  0x15   : > { %657 = vmatprep.mubr.bf16.mxu0 %v1751_v0  ;;  %710 = vmatprep.mubr.bf16.mxu1 %v1751_v0  ;;  %v272_v4 = vld [vmem:[%s2250_s2 + $0x18] sm:$0xff] }
  0x16   : > { %1589 = vset.pattern.permute.xlu0 %v1751_v0  ;;  %1590 = vset.pattern.permute.xlu1 %v1751_v0  ;;  %s1513_s4 = sshll.u32 %s191_s26, 9  ;;  %s186_s26 = sand.u32 1, %s1733_s13  }
  0x17   : > { %275 = vperm.xlu0 %1589, %v269_v1   ;;  %285 = vperm.xlu1 %1590, %v271_v2   ;;  %s1848_s9 = scalar_lea.vmem %s2248_s0, %s1513_s4  ;;  %s1423_s27 = sshll.u32 %s186_s26, 7 }
  0x18   : > { %v257_v5 = vld [vmem:[%s1848_s9 + $0x1c0] sm:$0xff]  ;;  %v258_v7 = vld [vmem:[%s1848_s9 + $0x1c8] sm:$0xff]  ;;  %s2070_s28 = scalar_lea.vmem [#allocation2], %s1423_s27  ;;  %s2203_s15 = scalar_lea.sflag [#allocation3], %s186_s26 }
  0x19   : > { %v261_v6 = vld [vmem:[%s1848_s9 + $0x1e0] sm:$0xff]  ;;  %v262_v9 = vld [vmem:[%s1848_s9 + $0x1e8] sm:$0xff]  ;;  %s1339_s30 = sshll.u32 %s2070_s28, 4  ;;  %s2198_s30 = int_to_ptr.vmem [resolvable:$true] %s1339_s30 }
  0x1a   : > { %v1485_v8 = vcombine.high %v257_v5, %v261_v6  ;;  %v1484_v10 = vcombine.low %v257_v5, %v261_v6  ;;  %v249_v11 = vld [vmem:[%s1848_s9 + $0x180] sm:$0xff]  ;;  %v1487_v13 = vcombine.high %v258_v7, %v262_v9  ;;  %v1486_v14 = vcombine.low %v258_v7, %v262_v9  ;;  %v250_v16 = vld [vmem:[%s1848_s9 + $0x188] sm:$0xff]  ;;  %v263_v5 = vld [vmem:[%s1848_s9 + $0x1f0] sm:$0xff]  ;;  %s1673_s7 = scalar_lea.vmem %s2198_s30, 2048 }
  0x1b   : > { %v253_v12 = vld [vmem:[%s1848_s9 + $0x1a0] sm:$0xff]  ;;  %280 = vperm.xlu0 %1589, %v270_v3   ;;  %v254_v17 = vld [vmem:[%s1848_s9 + $0x1a8] sm:$0xff]  ;;  %290 = vperm.xlu1 %1590, %v272_v4   ;;  %v259_v4 = vld [vmem:[%s1848_s9 + $0x1d0] sm:$0xff]  ;;  %p1674_p12 = scmp.ne.s32.totalorder %s2198_s30, %s1673_s7 }
  0x1c   : > { %v1477_v15 = vcombine.high %v249_v11, %v253_v12  ;;  %v241_v18 = vld [vmem:[%s1848_s9 + $0x140] sm:$0xff]  ;;  %625 = vmatprep.subr.bf16.mxu0 %v1485_v8  ;;  %v1479_v19 = vcombine.high %v250_v16, %v254_v17  ;;  %v242_v21 = vld [vmem:[%s1848_s9 + $0x148] sm:$0xff]  ;;  %678 = vmatprep.subr.bf16.mxu1 %v1487_v13  ;;  %v1476_v23 = vcombine.low %v249_v11, %v253_v12  ;;  %v260_v6 = vld [vmem:[%s1848_s9 + $0x1d8] sm:$0xff] }
  0x1d   : > { %v245_v20 = vld [vmem:[%s1848_s9 + $0x160] sm:$0xff]  ;;  %v246_v22 = vld [vmem:[%s1848_s9 + $0x168] sm:$0xff]  ;;  %626 = vmatpush1.bf16.msra.mxu0 %v1484_v10  ;;  %679 = vmatpush1.bf16.msra.mxu1 %v1486_v14  ;;  %v1478_v24 = vcombine.low %v250_v16, %v254_v17  ;;  %v264_v7 = vld [vmem:[%s1848_s9 + $0x1f8] sm:$0xff]  ;;  %v1489_v10 = vcombine.high %v259_v4, %v263_v5  ;;  %v1488_v17 = vcombine.low %v259_v4, %v263_v5  ;;  %p1675_p13 = pnand %p1674_p12, %p1815_p4 }
  0x1e   : > { %627 = vmatprep.subr.bf16.mxu0 %v1477_v15  ;;  %v1469_v25 = vcombine.high %v241_v18, %v245_v20  ;;  %680 = vmatprep.subr.bf16.mxu1 %v1479_v19  ;;  %v1471_v26 = vcombine.high %v242_v21, %v246_v22  ;;  %v233_v27 = vld [vmem:[%s1848_s9 + $0x100] sm:$0xff]  ;;  %v234_v29 = vld [vmem:[%s1848_s9 + $0x108] sm:$0xff]  ;;  %v1468_v31 = vcombine.low %v241_v18, %v245_v20  ;;  %v251_v12 = vld [vmem:[%s1848_s9 + $0x190] sm:$0xff] }
  0x1f   : > { %v237_v28 = vld [vmem:[%s1848_s9 + $0x120] sm:$0xff]  ;;  %v238_v30 = vld [vmem:[%s1848_s9 + $0x128] sm:$0xff]  ;;  %v1470_v32 = vcombine.low %v242_v21, %v246_v22  ;;  %v1491_v11 = vcombine.high %v260_v6, %v264_v7  ;;  %v255_v13 = vld [vmem:[%s1848_s9 + $0x1b0] sm:$0xff]  ;;  %v1490_v18 = vcombine.low %v260_v6, %v264_v7  ;;  %p1676_p0 = pneg %p1675_p13 }
  0x20   : > { %v1461_v33 = vcombine.high %v233_v27, %v237_v28  ;;  %v1463_v34 = vcombine.high %v234_v29, %v238_v30  ;;  %v225_v35 = vld [vmem:[%s1848_s9 + $0xc0] sm:$0xff]  ;;  %v226_v37 = vld [vmem:[%s1848_s9 + $0xc8] sm:$0xff]  ;;  %v1460_v39 = vcombine.low %v233_v27, %v237_v28  ;;  %v1462_v40 = vcombine.low %v234_v29, %v238_v30  ;;  %v252_v15 = vld [vmem:[%s1848_s9 + $0x198] sm:$0xff] }
  0x21   : > { %628 = vmatpush1.bf16.msra.mxu0 %v1476_v23  ;;  %681 = vmatpush1.bf16.msra.mxu1 %v1478_v24  ;;  %v229_v36 = vld [vmem:[%s1848_s9 + $0xe0] sm:$0xff]  ;;  %v230_v38 = vld [vmem:[%s1848_s9 + $0xe8] sm:$0xff]  ;;  %v256_v16 = vld [vmem:[%s1848_s9 + $0x1b8] sm:$0xff]  ;;  %v1481_v19 = vcombine.high %v251_v12, %v255_v13 }
  0x22   : > { %629 = vmatprep.subr.bf16.mxu0 %v1469_v25  ;;  %682 = vmatprep.subr.bf16.mxu1 %v1471_v26  ;;  %v1453_v41 = vcombine.high %v225_v35, %v229_v36  ;;  %v1455_v42 = vcombine.high %v226_v37, %v230_v38  ;;  %v217_v43 = vld [vmem:[%s1848_s9 + $0x80] sm:$0xff]  ;;  %v218_v45 = vld [vmem:[%s1848_s9 + $0x88] sm:$0xff]  ;;  %v1452_v47 = vcombine.low %v225_v35, %v229_v36  ;;  %v243_v21 = vld [vmem:[%s1848_s9 + $0x150] sm:$0xff] }
  0x23   : > { %v221_v44 = vld [vmem:[%s1848_s9 + $0xa0] sm:$0xff]  ;;  %v222_v46 = vld [vmem:[%s1848_s9 + $0xa8] sm:$0xff]  ;;  %v1454_v48 = vcombine.low %v226_v37, %v230_v38  ;;  %v1483_v20 = vcombine.high %v252_v15, %v256_v16  ;;  %v247_v22 = vld [vmem:[%s1848_s9 + $0x170] sm:$0xff]  ;;  %v1480_v25 = vcombine.low %v251_v12, %v255_v13  ;;  %v1482_v26 = vcombine.low %v252_v15, %v256_v16 }
  0x24   : > { %v1445_v49 = vcombine.high %v217_v43, %v221_v44  ;;  %v1447_v50 = vcombine.high %v218_v45, %v222_v46  ;;  %v209_v51 = vld [vmem:[%s1848_s9 + $0x40] sm:$0xff]  ;;  %v210_v53 = vld [vmem:[%s1848_s9 + $0x48] sm:$0xff]  ;;  %v1444_v55 = vcombine.low %v217_v43, %v221_v44  ;;  %v1446_v56 = vcombine.low %v218_v45, %v222_v46  ;;  %v244_v23 = vld [vmem:[%s1848_s9 + $0x158] sm:$0xff] }
  0x25   : > { %630 = vmatpush1.bf16.msra.mxu0 %v1468_v31  ;;  %683 = vmatpush1.bf16.msra.mxu1 %v1470_v32  ;;  %v213_v52 = vld [vmem:[%s1848_s9 + $0x60] sm:$0xff]  ;;  %v214_v54 = vld [vmem:[%s1848_s9 + $0x68] sm:$0xff]  ;;  %v248_v24 = vld [vmem:[%s1848_s9 + $0x178] sm:$0xff]  ;;  %v1473_v27 = vcombine.high %v243_v21, %v247_v22 }
  0x26   : > { %631 = vmatprep.subr.bf16.mxu0 %v1461_v33  ;;  %684 = vmatprep.subr.bf16.mxu1 %v1463_v34  ;;  %v1437_v57 = vcombine.high %v209_v51, %v213_v52  ;;  %v1439_v58 = vcombine.high %v210_v53, %v214_v54  ;;  %v201_v59 = vld [vmem:[%s1848_s9] sm:$0xff]  ;;  %v202_v61 = vld [vmem:[%s1848_s9 + $0x8] sm:$0xff]  ;;  %v1436_v63 = vcombine.low %v209_v51, %v213_v52  ;;  %v235_v29 = vld [vmem:[%s1848_s9 + $0x110] sm:$0xff] }
  0x27   : > { %v205_v60 = vld [vmem:[%s1848_s9 + $0x20] sm:$0xff]  ;;  %v206_v62 = vld [vmem:[%s1848_s9 + $0x28] sm:$0xff]  ;;  %v1438_v1 = vcombine.low %v210_v53, %v214_v54  ;;  %v1475_v28 = vcombine.high %v244_v23, %v248_v24  ;;  %v239_v30 = vld [vmem:[%s1848_s9 + $0x130] sm:$0xff]  ;;  %v1472_v34 = vcombine.low %v243_v21, %v247_v22  ;;  %v1474_v35 = vcombine.low %v244_v23, %v248_v24 }
  0x28   : > { %v1429_v2 = vcombine.high %v201_v59, %v205_v60  ;;  %v1431_v3 = vcombine.high %v202_v61, %v206_v62  ;;  %v1428_v8 = vcombine.low %v201_v59, %v205_v60  ;;  %v1430_v9 = vcombine.low %v202_v61, %v206_v62  ;;  %v1894_v14 = vld [vmem:[%s2249_s1] sm:$0xff]   ;;  %v236_v31 = vld [vmem:[%s1848_s9 + $0x118] sm:$0xff]  ;;  %v1913_v33 = vld [vmem:[%s2249_s1 + $0x8] sm:$0xff]  }
  0x29   : > { %632 = vmatpush1.bf16.msra.mxu0 %v1460_v39  ;;  %685 = vmatpush1.bf16.msra.mxu1 %v1462_v40  ;;  %v240_v32 = vld [vmem:[%s1848_s9 + $0x138] sm:$0xff]  ;;  %v1465_v36 = vcombine.high %v235_v29, %v239_v30  ;;  %v227_v38 = vld [vmem:[%s1848_s9 + $0xd0] sm:$0xff] }
  0x2a   : > { %633 = vmatprep.subr.bf16.mxu0 %v1453_v41  ;;  %686 = vmatprep.subr.bf16.mxu1 %v1455_v42  ;;  %v1467_v37 = vcombine.high %v236_v31, %v240_v32  ;;  %v231_v39 = vld [vmem:[%s1848_s9 + $0xf0] sm:$0xff]  ;;  %v228_v40 = vld [vmem:[%s1848_s9 + $0xd8] sm:$0xff]  ;;  %v1464_v42 = vcombine.low %v235_v29, %v239_v30  ;;  %v1466_v43 = vcombine.low %v236_v31, %v240_v32 }
  0x2b   : > { %v232_v41 = vld [vmem:[%s1848_s9 + $0xf8] sm:$0xff]  ;;  %v1457_v44 = vcombine.high %v227_v38, %v231_v39  ;;  %v219_v46 = vld [vmem:[%s1848_s9 + $0x90] sm:$0xff] }
  0x2c   : > { %v1459_v45 = vcombine.high %v228_v40, %v232_v41  ;;  %v1458_v51 = vcombine.low %v228_v40, %v232_v41  ;;  %v211_v54 = vld [vmem:[%s1848_s9 + $0x50] sm:$0xff] }
  0x2d   : > { %634 = vmatpush1.bf16.msra.mxu0 %v1452_v47  ;;  %687 = vmatpush1.bf16.msra.mxu1 %v1454_v48  ;;  %v223_v47 = vld [vmem:[%s1848_s9 + $0xb0] sm:$0xff]  ;;  %v220_v48 = vld [vmem:[%s1848_s9 + $0x98] sm:$0xff] }
  0x2e   : > { %635 = vmatprep.subr.bf16.mxu0 %v1445_v49  ;;  %688 = vmatprep.subr.bf16.mxu1 %v1447_v50  ;;  %v224_v49 = vld [vmem:[%s1848_s9 + $0xb8] sm:$0xff]  ;;  %v1456_v50 = vcombine.low %v227_v38, %v231_v39  ;;  %v1449_v52 = vcombine.high %v219_v46, %v223_v47  ;;  %v203_v62 = vld [vmem:[%s1848_s9 + $0x10] sm:$0xff] }
  0x2f   : > { %v1451_v53 = vcombine.high %v220_v48, %v224_v49  ;;  %v1450_v59 = vcombine.low %v220_v48, %v224_v49 }
  0x31   : > { %636 = vmatpush1.bf16.msra.mxu0 %v1444_v55  ;;  %689 = vmatpush1.bf16.msra.mxu1 %v1446_v56  ;;  %v215_v55 = vld [vmem:[%s1848_s9 + $0x70] sm:$0xff]  ;;  %v212_v56 = vld [vmem:[%s1848_s9 + $0x58] sm:$0xff] }
  0x32   : > { %637 = vmatprep.subr.bf16.mxu0 %v1437_v57  ;;  %690 = vmatprep.subr.bf16.mxu1 %v1439_v58  ;;  %v216_v57 = vld [vmem:[%s1848_s9 + $0x78] sm:$0xff]  ;;  %v1448_v58 = vcombine.low %v219_v46, %v223_v47  ;;  %v1441_v60 = vcombine.high %v211_v54, %v215_v55 }
  0x33   : > { %v1443_v61 = vcombine.high %v212_v56, %v216_v57  ;;  %v1442_v4 = vcombine.low %v212_v56, %v216_v57 }
  0x35   : > { %638 = vmatpush1.bf16.msra.mxu0 %v1436_v63  ;;  %691 = vmatpush1.bf16.msra.mxu1 %v1438_v1  ;;  %v207_v63 = vld [vmem:[%s1848_s9 + $0x30] sm:$0xff]  ;;  %v204_v1 = vld [vmem:[%s1848_s9 + $0x18] sm:$0xff] }
  0x36   : > { %639 = vmatprep.subr.bf16.mxu0 %v1429_v2  ;;  %692 = vmatprep.subr.bf16.mxu1 %v1431_v3  ;;  %v208_v2 = vld [vmem:[%s1848_s9 + $0x38] sm:$0xff]  ;;  %v1440_v3 = vcombine.low %v211_v54, %v215_v55  ;;  %v1433_v5 = vcombine.high %v203_v62, %v207_v63  ;;  %v1432_v7 = vcombine.low %v203_v62, %v207_v63  ;;  %s1677_s9 = sshll.u32 %s1752_s8, 4  ;;  %s1678_s9 = int_to_ptr.vmem [resolvable:$false] %s1677_s9 }
  0x37   : > { %v1435_v6 = vcombine.high %v204_v1, %v208_v2  ;;  %s1679_s10 = scalar_lea.vmem %s1678_s9, 4096  ;;  %p1680_p1 = scmp.lt.s32.totalorder %s2198_s30, %s1678_s9 }
  0x38   : > { %p1681_p2 = scmp.lt.s32.totalorder %s1679_s10, %s1673_s7 }
  0x39   : > { %640 = vmatpush1.bf16.msra.mxu0 %v1428_v8  ;;  %693 = vmatpush1.bf16.msra.mxu1 %v1430_v9  ;;  %v1434_v8 = vcombine.low %v204_v1, %v208_v2  ;;  %v837_v9 = vlaneseq }
  0x3a   : > { %731 = vmatprep.subr.bf16.mxu0 %v1489_v10  ;;  %784 = vmatprep.subr.bf16.mxu1 %v1491_v11  ;;  %p1682_p3 = por %p1681_p2, %p1680_p1 }
  0x3b   : > { %v1941_v10 = vshrl.u32 %v837_v9, 7 }
  0x3c   : > { %658 = vmatmul.mubr.bf16.vlgmr.msra.gmra.mxu0 %v1894_v14  ;;  %711 = vmatmul.mubr.bf16.vlgmr.msra.gmra.mxu1 %v1894_v14  ;;  %p1683_p5 = pnand %p1682_p3, %p1676_p0 }
  0x3d   : > { %732 = vmatpush1.bf16.msra.mxu0 %v1488_v17  ;;  %785 = vmatpush1.bf16.msra.mxu1 %v1490_v18  ;;  %vm839_vm0 = vcmp.lt.s32.totalorder %v1941_v10, 4  ;;  %vm840_vm1 = vcmp.ge.s32.totalorder %v1941_v10, 4 }
  0x3e   : > { %733 = vmatprep.subr.bf16.mxu0 %v1481_v19  ;;  %786 = vmatprep.subr.bf16.mxu1 %v1483_v20 }
  0x3f   : > { %667 = vmatprep.mubr.bf16.mxu0 %v1751_v0  ;;  %720 = vmatprep.mubr.bf16.mxu1 %v1751_v0 }
  0x41   : > { %734 = vmatpush1.bf16.msra.mxu0 %v1480_v25  ;;  %787 = vmatpush1.bf16.msra.mxu1 %v1482_v26 }
  0x42   : > { %735 = vmatprep.subr.bf16.mxu0 %v1473_v27  ;;  %788 = vmatprep.subr.bf16.mxu1 %v1475_v28 }
  0x44   : > { %668 = vmatmul.mubr.bf16.gmra.mxu0 %v1913_v33  ;;  %721 = vmatmul.mubr.bf16.gmra.mxu1 %v1913_v33 }
  0x45   : > { %736 = vmatpush1.bf16.msra.mxu0 %v1472_v34  ;;  %789 = vmatpush1.bf16.msra.mxu1 %v1474_v35 }
  0x46   : > { %737 = vmatprep.subr.bf16.mxu0 %v1465_v36  ;;  %790 = vmatprep.subr.bf16.mxu1 %v1467_v37 }
  0x47   : > { %763 = vmatprep.mubr.bf16.mxu0 %v1751_v0  ;;  %816 = vmatprep.mubr.bf16.mxu1 %v1751_v0 }
  0x49   : > { %738 = vmatpush1.bf16.msra.mxu0 %v1464_v42  ;;  %791 = vmatpush1.bf16.msra.mxu1 %v1466_v43 }
  0x4a   : > { %739 = vmatprep.subr.bf16.mxu0 %v1457_v44  ;;  %792 = vmatprep.subr.bf16.mxu1 %v1459_v45 }
  0x4d   : > { %740 = vmatpush1.bf16.msra.mxu0 %v1456_v50  ;;  %793 = vmatpush1.bf16.msra.mxu1 %v1458_v51 }
  0x4e   : > { %741 = vmatprep.subr.bf16.mxu0 %v1449_v52  ;;  %794 = vmatprep.subr.bf16.mxu1 %v1451_v53 }
  0x51   : > { %742 = vmatpush1.bf16.msra.mxu0 %v1448_v58  ;;  %795 = vmatpush1.bf16.msra.mxu1 %v1450_v59 }
  0x52   : > { %743 = vmatprep.subr.bf16.mxu0 %v1441_v60  ;;  %796 = vmatprep.subr.bf16.mxu1 %v1443_v61 }
  0x55   : > { %744 = vmatpush1.bf16.msra.mxu0 %v1440_v3  ;;  %797 = vmatpush1.bf16.msra.mxu1 %v1442_v4 }
  0x56   : > { %745 = vmatprep.subr.bf16.mxu0 %v1433_v5  ;;  %798 = vmatprep.subr.bf16.mxu1 %v1435_v6 }
  0x59   : > { %746 = vmatpush1.bf16.msra.mxu0 %v1432_v7  ;;  %799 = vmatpush1.bf16.msra.mxu1 %v1434_v8 }
  0x5c   : > { %764 = vmatmul.mubr.bf16.vlgmr.msra.gmra.mxu0 %v1894_v14  ;;  %817 = vmatmul.mubr.bf16.vlgmr.msra.gmra.mxu1 %v1894_v14 }
  0x5d   : > { %773 = vmatprep.mubr.bf16.mxu0 %v1751_v0  ;;  %826 = vmatprep.mubr.bf16.mxu1 %v1751_v0 }
  0x64   : > { %774 = vmatmul.mubr.bf16.gmra.mxu0 %v1913_v33  ;;  %827 = vmatmul.mubr.bf16.gmra.mxu1 %v1913_v33 }
  0x92   : > { %v1943_v11 = vpop.permute.xlu0 %275 }
  0x96   : > { %v1962_v19 = vpop.permute.xlu0 %280 }
  0xfc   : > { %v659_v12 = vpop.f32.mrf.mxu0  ;;  %v712_v14 = vpop.f32.mrf.mxu1 }
  0xfd   : > { %v1948_v13 = vadd.f32 %v659_v12, %v1943_v11  ;;  %v1951_v0 = vadd.f32 %v712_v14, %v1943_v11 }
  0xfe   : > { %v661_v15 = vpop.f32.mrf.mxu0  ;;  %v714_v24 = vpop.f32.mrf.mxu1 }
  0xff   : > { %v843_v16 = vsel %vm839_vm0, %v1948_v13, -1e+30  ;;  %v899_v17 = vsel %vm840_vm1, %v1948_v13, -1e+30  ;;  %v1960_v18 = vadd.f32 %v661_v15, %v1943_v11  ;;  %v845_v22 = vsel %vm839_vm0, %v1951_v0, -1e+30 }
 0x100   : > { %v851_v20 = vrot.slane %v843_v16, 4  ;;  %v907_v21 = vrot.slane %v899_v17, 4  ;;  %v901_v23 = vsel %vm840_vm1, %v1951_v0, -1e+30  ;;  %v663_v25 = vpop.f32.mrf.mxu0  ;;  %v863_v26 = vrot.slane %v845_v22, 4  ;;  %v716_v50 = vpop.f32.mrf.mxu1 }
 0x101   : > { %v919_v27 = vrot.slane %v901_v23, 4  ;;  %v844_v28 = vsel %vm839_vm0, %v1960_v18, -1e+30  ;;  %v900_v29 = vsel %vm840_vm1, %v1960_v18, -1e+30  ;;  %v1977_v36 = vadd.f32 %v714_v24, %v1943_v11 }
 0x102   : > { %v852_v30 = vmax.f32 %v843_v16, %v851_v20  ;;  %v908_v31 = vmax.f32 %v899_v17, %v907_v21  ;;  %v857_v32 = vrot.slane %v844_v28, 4  ;;  %v913_v33 = vrot.slane %v900_v29, 4  ;;  %v665_v63 = vpop.f32.mrf.mxu0  ;;  %v718_v5 = vpop.f32.mrf.mxu1 }
 0x103   : > { %v864_v34 = vmax.f32 %v845_v22, %v863_v26  ;;  %v920_v35 = vmax.f32 %v901_v23, %v919_v27  ;;  %v664_v37 = vadd.f32 %v663_v25, %v1962_v19  ;;  %v846_v44 = vsel %vm839_vm0, %v1977_v36, -1e+30 }
 0x104   : > { %v853_v38 = vrot.slane %v852_v30, 2  ;;  %v909_v39 = vrot.slane %v908_v31, 2  ;;  %v858_v40 = vmax.f32 %v844_v28, %v857_v32  ;;  %v914_v41 = vmax.f32 %v900_v29, %v913_v33  ;;  %v669_v12 = vpop.f32.mrf.mxu0  ;;  %v722_v20 = vpop.f32.mrf.mxu1 }
 0x105   : > { %v865_v42 = vrot.slane %v864_v34, 2  ;;  %v921_v43 = vrot.slane %v920_v35, 2  ;;  %v902_v45 = vsel %vm840_vm1, %v1977_v36, -1e+30  ;;  %v869_v53 = vrot.slane %v846_v44, 4  ;;  %v1996_v32 = vpop.permute.xlu1 %285 }
 0x106   : > { %v854_v46 = vmax.f32 %v852_v30, %v853_v38  ;;  %v910_v47 = vmax.f32 %v908_v31, %v909_v39  ;;  %v859_v48 = vrot.slane %v858_v40, 2  ;;  %v915_v49 = vrot.slane %v914_v41, 2 }
 0x107   : > { %v866_v51 = vmax.f32 %v864_v34, %v865_v42  ;;  %v922_v52 = vmax.f32 %v920_v35, %v921_v43  ;;  %v925_v54 = vrot.slane %v902_v45, 4  ;;  %v870_v61 = vmax.f32 %v846_v44, %v869_v53 }
 0x108   : > { %v855_v55 = vrot.slane %v854_v46, 1  ;;  %v911_v56 = vrot.slane %v910_v47, 1  ;;  %v860_v57 = vmax.f32 %v858_v40, %v859_v48  ;;  %v916_v58 = vmax.f32 %v914_v41, %v915_v49 }
 0x109   : > { %v867_v59 = vrot.slane %v866_v51, 1  ;;  %v923_v60 = vrot.slane %v922_v52, 1  ;;  %v926_v62 = vmax.f32 %v902_v45, %v925_v54  ;;  %v871_v8 = vrot.slane %v870_v61, 2 }
 0x10a   : > { %v856_v1 = vmax.f32 %v854_v46, %v855_v55  ;;  %v912_v2 = vmax.f32 %v910_v47, %v911_v56  ;;  %v861_v3 = vrot.slane %v860_v57, 1  ;;  %v917_v4 = vrot.slane %v916_v58, 1 }
 0x10b   : > { %v868_v6 = vmax.f32 %v866_v51, %v867_v59  ;;  %v924_v7 = vmax.f32 %v922_v52, %v923_v60  ;;  %v927_v9 = vrot.slane %v926_v62, 2  ;;  %v1159_v17 = vmul.f32 0.5, %v664_v37  ;;  %v724_v37 = vpop.f32.mrf.mxu1  ;;  %v2007_v52 = vpop.permute.xlu1 %290 }
 0x10c   : > { %v955_v14 = vsel %vm839_vm0, %v856_v1, %v912_v2  ;;  %v862_v15 = vmax.f32 %v860_v57, %v861_v3  ;;  %v918_v16 = vmax.f32 %v916_v58, %v917_v4  ;;  %v872_v23 = vmax.f32 %v870_v61, %v871_v8 }
 0x10d   : > { %v963_v21 = vsub.f32 %v1948_v13, %v955_v14  ;;  %v957_v22 = vsel %vm839_vm0, %v868_v6, %v924_v7  ;;  %v928_v24 = vmax.f32 %v926_v62, %v927_v9  ;;  %1593 = vtanh.f32 %v1159_v17  ;;  %v671_v13 = vpop.f32.mrf.mxu0 }
 0x10e   : > { %v965_v25 = vsub.f32 %v1951_v0, %v957_v22  ;;  %v956_v26 = vsel %vm839_vm0, %v862_v15, %v918_v16  ;;  %v717_v27 = vadd.f32 %v716_v50, %v1962_v19  ;;  %v873_v30 = vrot.slane %v872_v23, 1  ;;  %v726_v50 = vpop.f32.mrf.mxu1 }
 0x10f   : > { %v971_v28 = vmul.f32 1.442695, %v963_v21  ;;  %v964_v29 = vsub.f32 %v1960_v18, %v956_v26  ;;  %v929_v31 = vrot.slane %v928_v24, 1  ;;  %v666_v35 = vadd.f32 %v665_v63, %v1962_v19  ;;  %v673_v46 = vpop.f32.mrf.mxu0 }
 0x110   : > { %v975_v33 = vmul.f32 1.442695, %v965_v25  ;;  %v1161_v34 = vmul.f32 0.5, %v717_v27  ;;  %v719_v0 = vadd.f32 %v718_v5, %v1962_v19  ;;  %v874_v39 = vmax.f32 %v872_v23, %v873_v30  ;;  %v728_v58 = vpop.f32.mrf.mxu1 }
 0x111   : > { %1595 = vpow2.f32 %v971_v28  ;;  %v973_v38 = vmul.f32 1.442695, %v964_v29  ;;  %v930_v40 = vmax.f32 %v928_v24, %v929_v31  ;;  %v1160_v41 = vmul.f32 0.5, %v666_v35  ;;  %v675_v56 = vpop.f32.mrf.mxu0 }
 0x112   : > { %1597 = vpow2.f32 %v975_v33  ;;  %v1162_v42 = vmul.f32 0.5, %v719_v0  ;;  %v670_v18 = vadd.f32 %v669_v12, %v1996_v32  ;;  %v672_v44 = vadd.f32 %v671_v13, %v1996_v32 }
 0x113   : > { %1599 = vpow2.f32 %v973_v38  ;;  %v958_v43 = vsel %vm839_vm0, %v874_v39, %v930_v40  ;;  %v723_v45 = vadd.f32 %v722_v20, %v1996_v32  ;;  %v725_v49 = vadd.f32 %v724_v37, %v1996_v32 }
 0x114   : > { %v966_v47 = vsub.f32 %v1977_v36, %v958_v43  ;;  %1601 = vtanh.f32 %v1161_v34  ;;  %v1167_v48 = vmul.f32 0.5, %v670_v18  ;;  %v1168_v51 = vmul.f32 0.5, %v672_v44 }
 0x115   : > { %1603 = vtanh.f32 %v1160_v41  ;;  %v1169_v54 = vmul.f32 0.5, %v723_v45  ;;  %v1170_v55 = vmul.f32 0.5, %v725_v49  ;;  %v674_v57 = vadd.f32 %v673_v46, %v2007_v52 }
 0x116   : > { %v977_v53 = vmul.f32 1.442695, %v966_v47  ;;  %1605 = vtanh.f32 %v1162_v42  ;;  %v727_v36 = vadd.f32 %v726_v50, %v2007_v52  ;;  %v676_v59 = vadd.f32 %v675_v56, %v2007_v52 }
 0x117   : > { %1607 = vtanh.f32 %v1167_v48  ;;  %v729_v61 = vadd.f32 %v728_v58, %v2007_v52 }
 0x118   : > { %1609 = vpow2.f32 %v977_v53 }
 0x119   : > { %1611 = vtanh.f32 %v1168_v51 }
 0x11a   : > { %1613 = vtanh.f32 %v1169_v54  ;;  %v1594_v60 = vpop.eup %1593 }
 0x11b   : > { %1615 = vtanh.f32 %v1170_v55  ;;  %v1191_v62 = vadd.f32 1.0, %v1594_v60 }
 0x11c   : > { %1617 = vtanh.f32 %v674_v57  ;;  %v765_v63 = vpop.f32.mrf.mxu0  ;;  %v818_v2 = vpop.f32.mrf.mxu1 }
 0x11d   : > { %1619 = vtanh.f32 %v727_v36  ;;  %v2014_v1 = vadd.f32 %v765_v63, %v1943_v11  ;;  %v2018_v4 = vmul.f32 0.5, %v1191_v62  ;;  %v2021_v5 = vadd.f32 %v818_v2, %v1943_v11 }
 0x11e   : > { %v2016_v3 = vpop.eup %1595  ;;  %1621 = vtanh.f32 %v676_v59 }
 0x11f   : > { %v2023_v6 = vpop.eup %1597  ;;  %v987_v7 = vsel %vm839_vm0, %v2016_v3, 0.0  ;;  %v1043_v8 = vsel %vm840_vm1, %v2016_v3, 0.0  ;;  %1623 = vtanh.f32 %v729_v61  ;;  %v2034_v9 = vsel %vm839_vm0, %v2014_v1, -1e+30 }
 0x120   : > { %v2036_v12 = vpop.eup %1599  ;;  %v995_v14 = vrot.slane %v987_v7, 4  ;;  %v1051_v15 = vrot.slane %v1043_v8, 4  ;;  %v989_v16 = vsel %vm839_vm0, %v2023_v6, 0.0  ;;  %v1045_v17 = vsel %vm840_vm1, %v2023_v6, 0.0 }
 0x121   : > { %v1602_v20 = vpop.eup %1601  ;;  %v1007_v21 = vrot.slane %v989_v16, 4  ;;  %v1063_v22 = vrot.slane %v1045_v17, 4  ;;  %v988_v23 = vsel %vm839_vm0, %v2036_v12, 0.0  ;;  %v1044_v24 = vsel %vm840_vm1, %v2036_v12, 0.0 }
 0x122   : > { %v1604_v25 = vpop.eup %1603  ;;  %v996_v26 = vadd.f32 %v995_v14, %v987_v7  ;;  %v1052_v27 = vadd.f32 %v1051_v15, %v1043_v8  ;;  %v1001_v28 = vrot.slane %v988_v23, 4  ;;  %v1057_v29 = vrot.slane %v1044_v24, 4 }
 0x123   : > { %v1606_v30 = vpop.eup %1605  ;;  %v1008_v31 = vadd.f32 %v1007_v21, %v989_v16  ;;  %v1064_v13 = vadd.f32 %v1063_v22, %v1045_v17  ;;  %v1193_v33 = vadd.f32 1.0, %v1602_v20  ;;  %v1192_v34 = vadd.f32 1.0, %v1604_v25 }
 0x124   : > { %v1608_v35 = vpop.eup %1607  ;;  %v997_v0 = vrot.slane %v996_v26, 2  ;;  %v1053_v37 = vrot.slane %v1052_v27, 2  ;;  %v1002_v38 = vadd.f32 %v1001_v28, %v988_v23  ;;  %v1058_v39 = vadd.f32 %v1057_v29, %v1044_v24 }
 0x125   : > { %v2050_v40 = vpop.eup %1609  ;;  %v1009_v41 = vrot.slane %v1008_v31, 2  ;;  %v1065_v42 = vrot.slane %v1064_v13, 2  ;;  %v2053_v18 = vmul.f32 0.5, %v1193_v33  ;;  %v1208_v43 = vmul.f32 0.5, %v1192_v34 }
 0x126   : > { %v1612_v44 = vpop.eup %1611  ;;  %v998_v45 = vadd.f32 %v997_v0, %v996_v26  ;;  %v1054_v46 = vadd.f32 %v1053_v37, %v1052_v27  ;;  %v1003_v47 = vrot.slane %v1002_v38, 2  ;;  %v1059_v48 = vrot.slane %v1058_v39, 2 }
 0x127   : > { %v1614_v49 = vpop.eup %1613  ;;  %v1010_v50 = vadd.f32 %v1009_v41, %v1008_v31  ;;  %v1066_v51 = vadd.f32 %v1065_v42, %v1064_v13  ;;  %v990_v53 = vsel %vm839_vm0, %v2050_v40, 0.0  ;;  %v1046_v54 = vsel %vm840_vm1, %v2050_v40, 0.0 }
 0x128   : > { %v1616_v55 = vpop.eup %1615  ;;  %v999_v56 = vrot.slane %v998_v45, 1  ;;  %v1055_v57 = vrot.slane %v1054_v46, 1  ;;  %v1004_v58 = vadd.f32 %v1003_v47, %v1002_v38  ;;  %v1060_v36 = vadd.f32 %v1059_v48, %v1058_v39 }
 0x129   : > { %v1618_v59 = vpop.eup %1617  ;;  %v1011_v60 = vrot.slane %v1010_v50, 1  ;;  %v1067_v61 = vrot.slane %v1066_v51, 1  ;;  %v1013_v62 = vrot.slane %v990_v53, 4  ;;  %v1069_v63 = vrot.slane %v1046_v54, 4 }
 0x12a   : > { %v1620_v2 = vpop.eup %1619  ;;  %v1000_v7 = vadd.f32 %v999_v56, %v998_v45  ;;  %v1056_v8 = vadd.f32 %v1055_v57, %v1054_v46  ;;  %v1005_v14 = vrot.slane %v1004_v58, 1  ;;  %v1061_v15 = vrot.slane %v1060_v36, 1 }
 0x12b   : > { %v1622_v16 = vpop.eup %1621  ;;  %v1012_v17 = vadd.f32 %v1011_v60, %v1010_v50  ;;  %v1068_v20 = vadd.f32 %v1067_v61, %v1066_v51  ;;  %v1014_v21 = vadd.f32 %v1013_v62, %v990_v53  ;;  %v1070_v22 = vadd.f32 %v1069_v63, %v1046_v54 }
 0x12c   : > { %v1624_v23 = vpop.eup %1623  ;;  %v1099_v24 = vsel %vm839_vm0, %v1000_v7, %v1056_v8  ;;  %v1006_v25 = vadd.f32 %v1005_v14, %v1004_v58  ;;  %v1062_v26 = vadd.f32 %v1061_v15, %v1060_v36  ;;  %v1518_v27 = vpack.c.bf16 %v1208_v43, %v2018_v4  ;;  %v767_v43 = vpop.f32.mrf.mxu0 }
 0x12d   : > { %1625 = vrcp.f32 %v1099_v24  ;;  %v1101_v28 = vsel %vm839_vm0, %v1012_v17, %v1068_v20  ;;  %v1015_v29 = vrot.slane %v1014_v21, 2  ;;  %v1071_v31 = vrot.slane %v1070_v22, 2 }
 0x12e   : > { %1627 = vrcp.f32 %v1101_v28  ;;  %v1100_v13 = vsel %vm839_vm0, %v1006_v25, %v1062_v26  ;;  %1271 = vst [vmem:[%s2070_s28 + $0x20] sm:$0xff] %v1518_v27  ;;  %v1194_v33 = vadd.f32 1.0, %v1606_v30  ;;  %v1199_v34 = vadd.f32 1.0, %v1608_v35  ;;  %v769_v36 = vpop.f32.mrf.mxu0 }
 0x12f   : > { %1629 = vrcp.f32 %v1100_v13  ;;  %v1016_v0 = vadd.f32 %v1015_v29, %v1014_v21  ;;  %v1072_v37 = vadd.f32 %v1071_v31, %v1070_v22  ;;  %v1200_v4 = vadd.f32 1.0, %v1612_v44 }
 0x130   : > { %v1210_v38 = vmul.f32 0.5, %v1194_v33  ;;  %v1215_v39 = vmul.f32 0.5, %v1199_v34  ;;  %v1201_v41 = vadd.f32 1.0, %v1614_v49  ;;  %v1202_v42 = vadd.f32 1.0, %v1616_v55  ;;  %v820_v55 = vpop.f32.mrf.mxu1 }
 0x131   : > { %v1017_v45 = vrot.slane %v1016_v0, 1  ;;  %v1073_v46 = vrot.slane %v1072_v37, 1  ;;  %v1216_v47 = vmul.f32 0.5, %v1200_v4  ;;  %v1526_v48 = vpack.c.bf16 %v1622_v16, %v1618_v59 }
 0x132   : > { %v1519_v50 = vpack.c.bf16 %v1210_v38, %v2053_v18  ;;  %v1217_v30 = vmul.f32 0.5, %v1201_v41  ;;  %v1218_v35 = vmul.f32 0.5, %v1202_v42  ;;  %v1527_v51 = vpack.c.bf16 %v1624_v23, %v1620_v2 }
 0x133   : > { %v1018_v53 = vadd.f32 %v1017_v45, %v1016_v0  ;;  %v1074_v44 = vadd.f32 %v1073_v46, %v1072_v37  ;;  %v1522_v54 = vpack.c.bf16 %v1216_v47, %v1215_v39  ;;  %1319 = vst [vmem:[%s2070_s28 + $0x60] sm:$0xff] %v1526_v48  ;;  %v875_v49 = vrot.slane %v2034_v9, 4 }
 0x134   : > { %1272 = vst [vmem:[%s2070_s28 + $0x28] sm:$0xff] %v1519_v50  ;;  %v1523_v56 = vpack.c.bf16 %v1218_v35, %v1217_v30  ;;  %1320 = vst [vmem:[%s2070_s28 + $0x68] sm:$0xff] %v1527_v51  ;;  %v903_v57 = vsel %vm840_vm1, %v2014_v1, -1e+30  ;;  %v849_v18 = vsel %vm839_vm0, %v2021_v5, -1e+30  ;;  %v2093_v2 = vadd.f32 %v767_v43, %v1943_v11 }
 0x135   : > { %v905_v58 = vsel %vm840_vm1, %v2021_v5, -1e+30  ;;  %v1102_v59 = vsel %vm839_vm0, %v1018_v53, %v1074_v44  ;;  %1275 = vst [vmem:[%s2070_s28 + $0x40] sm:$0xff] %v1522_v54  ;;  %v876_v60 = vmax.f32 %v2034_v9, %v875_v49  ;;  %v931_v61 = vrot.slane %v903_v57, 4 }
 0x136   : > { %v887_v62 = vrot.slane %v849_v18, 4  ;;  %1631 = vrcp.f32 %v1102_v59  ;;  %1276 = vst [vmem:[%s2070_s28 + $0x48] sm:$0xff] %v1523_v56  ;;  %v943_v63 = vrot.slane %v905_v58, 4  ;;  %v2096_v7 = vadd.f32 %v820_v55, %v1943_v11 }
 0x137   : > { %v877_v8 = vrot.slane %v876_v60, 2  ;;  %v932_v14 = vmax.f32 %v903_v57, %v931_v61  ;;  %v770_v16 = vadd.f32 %v769_v36, %v1962_v19  ;;  %v848_v9 = vsel %vm839_vm0, %v2093_v2, -1e+30 }
 0x138   : > { %v888_v15 = vmax.f32 %v849_v18, %v887_v62  ;;  %v944_v17 = vmax.f32 %v905_v58, %v943_v63  ;;  %v904_v20 = vsel %vm840_vm1, %v2093_v2, -1e+30  ;;  %v850_v21 = vsel %vm839_vm0, %v2096_v7, -1e+30  ;;  %v771_v58 = vpop.f32.mrf.mxu0 }
 0x139   : > { %v878_v11 = vmax.f32 %v876_v60, %v877_v8  ;;  %v933_v22 = vrot.slane %v932_v14, 2  ;;  %v881_v24 = vrot.slane %v848_v9, 4  ;;  %v937_v27 = vrot.slane %v904_v20, 4 }
 0x13a   : > { %v889_v23 = vrot.slane %v888_v15, 2  ;;  %v1626_v25 = vpop.eup %1625  ;;  %v945_v26 = vrot.slane %v944_v17, 2  ;;  %v893_v28 = vrot.slane %v850_v21, 4  ;;  %v906_v29 = vsel %vm840_vm1, %v2096_v7, -1e+30 }
 0x13b   : > { %v1628_v31 = vpop.eup %1627  ;;  %v1108_v13 = vmul.f32 %v1626_v25, %v2016_v3  ;;  %v879_v33 = vrot.slane %v878_v11, 1  ;;  %v934_v34 = vmax.f32 %v932_v14, %v933_v22  ;;  %v882_v39 = vmax.f32 %v848_v9, %v881_v24  ;;  %v822_v3 = vpop.f32.mrf.mxu1 }
 0x13c   : > { %v890_v0 = vmax.f32 %v888_v15, %v889_v23  ;;  %v1630_v37 = vpop.eup %1629  ;;  %v1112_v4 = vmul.f32 %v1628_v31, %v2023_v6  ;;  %v946_v38 = vmax.f32 %v944_v17, %v945_v26  ;;  %v938_v41 = vmax.f32 %v904_v20, %v937_v27  ;;  %v775_v17 = vpop.f32.mrf.mxu0 }
 0x13d   : > { %v1110_v42 = vmul.f32 %v1630_v37, %v2036_v12  ;;  %v880_v43 = vmax.f32 %v878_v11, %v879_v33  ;;  %v935_v45 = vrot.slane %v934_v34, 1  ;;  %v883_v48 = vrot.slane %v882_v39, 2  ;;  %v824_v62 = vpop.f32.mrf.mxu1 }
 0x13e   : > { %v891_v46 = vrot.slane %v890_v0, 1  ;;  %v947_v47 = vrot.slane %v946_v38, 1  ;;  %v939_v50 = vrot.slane %v938_v41, 2  ;;  %v894_v30 = vmax.f32 %v850_v21, %v893_v28 }
 0x13f   : > { %v1514_v35 = vpack.c.bf16 %v1110_v42, %v1108_v13  ;;  %v936_v51 = vmax.f32 %v934_v34, %v935_v45  ;;  %v949_v44 = vrot.slane %v906_v29, 4  ;;  %v884_v6 = vmax.f32 %v882_v39, %v883_v48 }
 0x140   : > { %v892_v53 = vmax.f32 %v890_v0, %v891_v46  ;;  %v948_v54 = vmax.f32 %v946_v38, %v947_v47  ;;  %v940_v49 = vmax.f32 %v938_v41, %v939_v50  ;;  %v895_v55 = vrot.slane %v894_v30, 2 }
 0x141   : > { %1155 = vst [vmem:[%s2070_s28] sm:$0xff] %v1514_v35  ;;  %v959_v12 = vsel %vm839_vm0, %v880_v43, %v936_v51  ;;  %v950_v56 = vmax.f32 %v906_v29, %v949_v44  ;;  %v1163_v57 = vmul.f32 0.5, %v770_v16  ;;  %v823_v18 = vadd.f32 %v822_v3, %v1962_v19  ;;  %v777_v29 = vpop.f32.mrf.mxu0 }
 0x142   : > { %v967_v36 = vsub.f32 %v2014_v1, %v959_v12  ;;  %v961_v59 = vsel %vm839_vm0, %v892_v53, %v948_v54  ;;  %v885_v60 = vrot.slane %v884_v6, 1  ;;  %v941_v61 = vrot.slane %v940_v49, 1  ;;  %v828_v1 = vpop.f32.mrf.mxu1 }
 0x143   : > { %v1632_v63 = vpop.eup %1631  ;;  %v969_v8 = vsub.f32 %v2021_v5, %v961_v59  ;;  %v896_v14 = vmax.f32 %v894_v30, %v895_v55  ;;  %v951_v15 = vrot.slane %v950_v56, 2  ;;  %1633 = vtanh.f32 %v1163_v57 }
 0x144   : > { %v1114_v16 = vmul.f32 %v1632_v63, %v2050_v40  ;;  %v979_v9 = vmul.f32 1.442695, %v967_v36  ;;  %v886_v20 = vmax.f32 %v884_v6, %v885_v60  ;;  %v942_v21 = vmax.f32 %v940_v49, %v941_v61  ;;  %v830_v34 = vpop.f32.mrf.mxu1 }
 0x145   : > { %v983_v11 = vmul.f32 1.442695, %v969_v8  ;;  %v897_v22 = vrot.slane %v896_v14, 1  ;;  %v952_v23 = vmax.f32 %v950_v56, %v951_v15  ;;  %v1165_v24 = vmul.f32 0.5, %v823_v18 }
 0x146   : > { %v1515_v25 = vpack.c.bf16 %v1114_v16, %v1112_v4  ;;  %1635 = vpow2.f32 %v979_v9  ;;  %v960_v5 = vsel %vm839_vm0, %v886_v20, %v942_v21  ;;  %v772_v26 = vadd.f32 %v771_v58, %v1962_v19  ;;  %v832_v46 = vpop.f32.mrf.mxu1 }
 0x147   : > { %1637 = vpow2.f32 %v983_v11  ;;  %v968_v27 = vsub.f32 %v2093_v2, %v960_v5  ;;  %v898_v40 = vmax.f32 %v896_v14, %v897_v22  ;;  %v953_v28 = vrot.slane %v952_v23, 1 }
 0x148   : > { %1156 = vst [vmem:[%s2070_s28 + $0x8] sm:$0xff] %v1515_v25  ;;  %1639 = vtanh.f32 %v1165_v24  ;;  %v1164_v31 = vmul.f32 0.5, %v772_v26  ;;  %v825_v13 = vadd.f32 %v824_v62, %v1962_v19  ;;  %v776_v33 = vadd.f32 %v775_v17, %v1996_v32  ;;  %v779_v19 = vpop.f32.mrf.mxu0  ;;  %v834_v51 = vpop.f32.mrf.mxu1 }
 0x149   : > { %v981_v0 = vmul.f32 1.442695, %v968_v27  ;;  %v954_v37 = vmax.f32 %v952_v23, %v953_v28  ;;  %v829_v4 = vadd.f32 %v828_v1, %v1996_v32  ;;  %v778_v38 = vadd.f32 %v777_v29, %v1996_v32 }
 0x14a   : > { %1641 = vtanh.f32 %v1164_v31  ;;  %v1166_v39 = vmul.f32 0.5, %v825_v13  ;;  %v1171_v2 = vmul.f32 0.5, %v776_v33  ;;  %v831_v41 = vadd.f32 %v830_v34, %v1996_v32  ;;  %v781_v3 = vpop.f32.mrf.mxu0 }
 0x14b   : > { %1643 = vpow2.f32 %v981_v0  ;;  %v962_v42 = vsel %vm839_vm0, %v898_v40, %v954_v37  ;;  %v1173_v43 = vmul.f32 0.5, %v829_v4  ;;  %v1172_v47 = vmul.f32 0.5, %v778_v38 }
 0x14c   : > { %v970_v45 = vsub.f32 %v2096_v7, %v962_v42  ;;  %1645 = vtanh.f32 %v1166_v39  ;;  %v1174_v50 = vmul.f32 0.5, %v831_v41  ;;  %v780_v30 = vadd.f32 %v779_v19, %v2007_v52 }
 0x14d   : > { %1647 = vtanh.f32 %v1171_v2  ;;  %v833_v32 = vadd.f32 %v832_v46, %v2007_v52  ;;  %v782_v53 = vadd.f32 %v781_v3, %v2007_v52  ;;  %v835_v54 = vadd.f32 %v834_v51, %v2007_v52 }
 0x14e   : > { %v985_v48 = vmul.f32 1.442695, %v970_v45  ;;  %1649 = vtanh.f32 %v1173_v43 }
 0x150   : > { %v1634_v35 = vpop.eup %1633  ;;  %1651 = vpow2.f32 %v985_v48 }
 0x151   : > { %1653 = vtanh.f32 %v1172_v47  ;;  %v1195_v44 = vadd.f32 1.0, %v1634_v35 }
 0x152   : > { %1655 = vtanh.f32 %v1174_v50 }
 0x153   : > { %v2139_v7 = vpop.eup %1635  ;;  %1657 = vtanh.f32 %v780_v30  ;;  %v1211_v63 = vmul.f32 0.5, %v1195_v44 }
 0x154   : > { %v2142_v6 = vpop.eup %1637  ;;  %v991_v49 = vsel %vm839_vm0, %v2139_v7, 0.0  ;;  %v1047_v55 = vsel %vm840_vm1, %v2139_v7, 0.0  ;;  %1659 = vtanh.f32 %v833_v32 }
 0x155   : > { %v1640_v12 = vpop.eup %1639  ;;  %v1019_v56 = vrot.slane %v991_v49, 4  ;;  %v1075_v57 = vrot.slane %v1047_v55, 4  ;;  %v993_v18 = vsel %vm839_vm0, %v2142_v6, 0.0  ;;  %v1049_v52 = vsel %vm840_vm1, %v2142_v6, 0.0 }
 0x156   : > { %v1031_v58 = vrot.slane %v993_v18, 4  ;;  %v1087_v36 = vrot.slane %v1049_v52, 4  ;;  %v1197_v59 = vadd.f32 1.0, %v1640_v12  ;;  %1661 = vtanh.f32 %v782_v53 }
 0x157   : > { %v1642_v60 = vpop.eup %1641  ;;  %v1020_v61 = vadd.f32 %v1019_v56, %v991_v49  ;;  %v1076_v62 = vadd.f32 %v1075_v57, %v1047_v55  ;;  %1663 = vtanh.f32 %v835_v54 }
 0x158   : > { %v2156_v8 = vpop.eup %1643  ;;  %v1032_v14 = vadd.f32 %v1031_v58, %v993_v18  ;;  %v1088_v15 = vadd.f32 %v1087_v36, %v1049_v52  ;;  %v1213_v17 = vmul.f32 0.5, %v1197_v59  ;;  %v1196_v16 = vadd.f32 1.0, %v1642_v60 }
 0x159   : > { %v1646_v9 = vpop.eup %1645  ;;  %v1021_v20 = vrot.slane %v1020_v61, 2  ;;  %v1077_v21 = vrot.slane %v1076_v62, 2  ;;  %v992_v1 = vsel %vm839_vm0, %v2156_v8, 0.0  ;;  %v1048_v11 = vsel %vm840_vm1, %v2156_v8, 0.0 }
 0x15a   : > { %v1033_v22 = vrot.slane %v1032_v14, 2  ;;  %v1089_v23 = vrot.slane %v1088_v15, 2  ;;  %v1025_v24 = vrot.slane %v992_v1, 4  ;;  %v1081_v25 = vrot.slane %v1048_v11, 4  ;;  %v1648_v5 = vpop.eup %1647 }
 0x15b   : > { %v1022_v26 = vadd.f32 %v1021_v20, %v1020_v61  ;;  %v1078_v27 = vadd.f32 %v1077_v21, %v1076_v62  ;;  %v1212_v40 = vmul.f32 0.5, %v1196_v16  ;;  %v1198_v28 = vadd.f32 1.0, %v1646_v9  ;;  %v1650_v29 = vpop.eup %1649 }
 0x15c   : > { %v1034_v31 = vadd.f32 %v1033_v22, %v1032_v14  ;;  %v1090_v13 = vadd.f32 %v1089_v23, %v1088_v15  ;;  %v1026_v33 = vadd.f32 %v1025_v24, %v992_v1  ;;  %v1082_v34 = vadd.f32 %v1081_v25, %v1048_v11 }
 0x15d   : > { %v2164_v0 = vpop.eup %1651  ;;  %v1023_v37 = vrot.slane %v1022_v26, 1  ;;  %v1079_v4 = vrot.slane %v1078_v27, 1  ;;  %v1520_v38 = vpack.c.bf16 %v1212_v40, %v1211_v63  ;;  %v1214_v39 = vmul.f32 0.5, %v1198_v28 }
 0x15e   : > { %v1654_v2 = vpop.eup %1653  ;;  %v1035_v41 = vrot.slane %v1034_v31, 1  ;;  %v1091_v42 = vrot.slane %v1090_v13, 1  ;;  %v1027_v43 = vrot.slane %v1026_v33, 2  ;;  %v1083_v19 = vrot.slane %v1082_v34, 2 }
 0x15f   : > { %v1656_v45 = vpop.eup %1655  ;;  %v1024_v46 = vadd.f32 %v1023_v37, %v1022_v26  ;;  %v1080_v47 = vadd.f32 %v1079_v4, %v1078_v27  ;;  %v994_v48 = vsel %vm839_vm0, %v2164_v0, 0.0  ;;  %v1050_v50 = vsel %vm840_vm1, %v2164_v0, 0.0  ;;  %1273 = vst [vmem:[%s2070_s28 + $0x30] sm:$0xff] %v1520_v38 }
 0x160   : > { %v1658_v30 = vpop.eup %1657  ;;  %v1028_v3 = vadd.f32 %v1027_v43, %v1026_v33  ;;  %v1084_v35 = vadd.f32 %v1083_v19, %v1082_v34  ;;  %v1037_v53 = vrot.slane %v994_v48, 4  ;;  %v1093_v44 = vrot.slane %v1050_v50, 4 }
 0x161   : > { %v1660_v32 = vpop.eup %1659  ;;  %v1103_v51 = vsel %vm839_vm0, %v1024_v46, %v1080_v47  ;;  %v1521_v54 = vpack.c.bf16 %v1214_v39, %v1213_v17  ;;  %v1036_v49 = vadd.f32 %v1035_v41, %v1034_v31  ;;  %v1092_v55 = vadd.f32 %v1091_v42, %v1090_v13 }
 0x162   : > { %v1029_v12 = vrot.slane %v1028_v3, 1  ;;  %v1085_v56 = vrot.slane %v1084_v35, 1  ;;  %1665 = vrcp.f32 %v1103_v51  ;;  %v1038_v18 = vadd.f32 %v1037_v53, %v994_v48 }
 0x163   : > { %v1662_v57 = vpop.eup %1661  ;;  %v1094_v52 = vadd.f32 %v1093_v44, %v1050_v50  ;;  %1274 = vst [vmem:[%s2070_s28 + $0x38] sm:$0xff] %v1521_v54  ;;  %v1203_v58 = vadd.f32 1.0, %v1648_v5  ;;  %v1205_v61 = vadd.f32 1.0, %v1650_v29  ;;  %v1204_v62 = vadd.f32 1.0, %v1654_v2 }
 0x164   : > { %v1664_v36 = vpop.eup %1663  ;;  %v1030_v59 = vadd.f32 %v1029_v12, %v1028_v3  ;;  %v1086_v60 = vadd.f32 %v1085_v56, %v1084_v35  ;;  %v1039_v63 = vrot.slane %v1038_v18, 2  ;;  %v1206_v17 = vadd.f32 1.0, %v1656_v45 }
 0x165   : > { %v1095_v14 = vrot.slane %v1094_v52, 2  ;;  %v1219_v15 = vmul.f32 0.5, %v1203_v58  ;;  %v1221_v9 = vmul.f32 0.5, %v1205_v61  ;;  %v1220_v20 = vmul.f32 0.5, %v1204_v62 }
 0x166   : > { %v1104_v16 = vsel %vm839_vm0, %v1030_v59, %v1086_v60  ;;  %v1528_v21 = vpack.c.bf16 %v1662_v57, %v1658_v30  ;;  %v1040_v1 = vadd.f32 %v1039_v63, %v1038_v18  ;;  %v1222_v22 = vmul.f32 0.5, %v1206_v17 }
 0x167   : > { %1667 = vrcp.f32 %v1104_v16  ;;  %v1096_v11 = vadd.f32 %v1095_v14, %v1094_v52  ;;  %v1524_v23 = vpack.c.bf16 %v1220_v20, %v1219_v15  ;;  %v1529_v24 = vpack.c.bf16 %v1664_v36, %v1660_v32 }
 0x168   : > { %1321 = vst [vmem:[%s2070_s28 + $0x70] sm:$0xff] %v1528_v21  ;;  %v1105_v25 = vsel %vm839_vm0, %v1036_v49, %v1092_v55  ;;  %v1041_v5 = vrot.slane %v1040_v1, 1  ;;  %v1525_v27 = vpack.c.bf16 %v1222_v22, %v1221_v9 }
 0x169   : > { %v1097_v26 = vrot.slane %v1096_v11, 1  ;;  %1277 = vst [vmem:[%s2070_s28 + $0x50] sm:$0xff] %v1524_v23  ;;  %1322 = vst [vmem:[%s2070_s28 + $0x78] sm:$0xff] %v1529_v24  ;;  %1669 = vrcp.f32 %v1105_v25 }
 0x16a   : > { %v1042_v40 = vadd.f32 %v1041_v5, %v1040_v1  ;;  %1278 = vst [vmem:[%s2070_s28 + $0x58] sm:$0xff] %v1525_v27 }
 0x16b   : > { %v1098_v28 = vadd.f32 %v1097_v26, %v1096_v11 }
 0x16d   : > { %v1106_v29 = vsel %vm839_vm0, %v1042_v40, %v1098_v28 }
 0x16e   : > { %1671 = vrcp.f32 %v1106_v29 }
 0x16f   : > { %v1666_v31 = vpop.eup %1665 }
 0x170   : > { %v1116_v33 = vmul.f32 %v1666_v31, %v2139_v7 }
 0x174   : > { %v1668_v13 = vpop.eup %1667 }
 0x175   : > { %v1118_v34 = vmul.f32 %v1668_v13, %v2156_v8 }
 0x176   : > { %v1670_v4 = vpop.eup %1669 }
 0x177   : > { %v1516_v37 = vpack.c.bf16 %v1118_v34, %v1116_v33  ;;  %v1120_v39 = vmul.f32 %v1670_v4, %v2142_v6 }
 0x179   : > { %1157 = vst [vmem:[%s2070_s28 + $0x10] sm:$0xff] %v1516_v37 }
 0x17b   : > { %v1672_v38 = vpop.eup %1671 }
 0x17c   : > { %v1122_v10 = vmul.f32 %v1672_v38, %v2164_v0 }
 0x17e   : > { %v1517_v7 = vpack.c.bf16 %v1122_v10, %v1120_v39 }
 0x180   : > { %1158 = vst [vmem:[%s2070_s28 + $0x18] sm:$0xff] %v1517_v7 }
 0x181   : > { %1686 = shalt.err (!%p1683_p5)
}
 0x182   : > { %s1687_s11 = scalar_lea.hbm %s2196_s6, 2048  ;;  %s1691_s21 = scalar_lea.hbm %s2251_s3, 4096 }
 0x183   : > { %p1688_p6 = scmp.ne.s32.totalorder %s2196_s6, %s1687_s11  ;;  %p1692_p10 = scmp.lt.s32.totalorder %s2196_s6, %s2251_s3 }
 0x184   : > { %p1693_p11 = scmp.lt.s32.totalorder %s1691_s21, %s1687_s11 }
 0x185   : > { %p1689_p7 = pnand %p1688_p6, %p1815_p4 }
 0x186   : > { %p1694_p12 = por %p1693_p11, %p1692_p10 }
 0x187   : > { %p1690_p9 = pneg %p1689_p7 }
 0x189   : > { %p1695_p13 = pnand %p1694_p12, %p1690_p9 }
 0x18b   : > { %1698 = shalt.err (!%p1695_p13)
}
 0x18c   : > { %s1753_s27 = smov 512   ;;  %s1754_s28 = smov 32  }
 0x18d   : > { %1531 = dma.vmem_to_hbm [thread:$0]  (%p1815_p4), %s2198_s30, 2048, %s2196_s6, %s2203_s15, %s1753_s27, %s1753_s27, %s1754_s28  }
 0x18e PF: > { %p1537_p0 = scmp.ge.s32.totalorder %s1749_s17, 2  ;;  %s1354_s29 = sand.u32 1, %s1729_s12  }
 0x18f   : > { %s1355_s4 = scalar_lea.sflag [#allocation3], %s1354_s29 }
 0x190   : > { %p1534_p1 = pnand %p1537_p0, %p1822_p8 }
 0x192   : > { %p1535_p2 = pneg %p1534_p1 }
 0x194   : > { %1724 = dma.done.wait (%p1535_p2), %s1355_s4, 2048  }
 0x195   : > { %1726 = vsyncadd (%p1535_p2), %s1355_s4, 4294965248  ;;  %s16_s17 = sadd.s32 1, %s1749_s17   ;;  %s2254_s12 = smov %s1733_s13 }
 0x196   : > { %p13_p3 = scmp.ge.s32.totalorder %s16_s17, 4   ;;  %s2255_s13 = smov %s1737_s14 }
 0x197   : > { %s2256_s14 = smov %s1828_s25  ;;  %s2257_s15 = smov %s1745_s16 }
 0x198   : > { %s2258_s16 = smov %s2260_s20  ;;  %15 = sbr.rel (!%p13_p3) target bundleno = 4 (0x4), region = 67 }
 0x19d   :  { %1360 = vsyncpa [#allocation3], 1 }
 0x19e   :  { %1362 = vsyncpa [#allocation3 + $0x1], 1 }

</bundles_post_ra>
